<compile_context>
chip_gen: v5e
topology: v5e:2x2
jax: 0.10.0
libtpu: 0.0.40
codegen_flags: <defaults>
</compile_context>

<pallas_src>
import functools

import jax
import jax.numpy as jnp
from jax.experimental import pallas as pl
from jax.experimental.pallas import tpu as pltpu


def _round_up(x: int, m: int) -> int:
    return (x + m - 1) // m * m


def _agru_fused_kernel(facts_ref, g_ref, h0_ref, wcat_ref, bcat_ref,
                       out_ref, h_scr, x_scr, *, rep_pad, h_pad):
    """One grid step t of the fused attention-GRU recurrence.

    Refs (all VMEM resident):
      facts_ref : (1, B_pad, REP_PAD) f32   fact for step t
      g_ref     : (1, B_pad, 1)       f32   attention gate for step t
      h0_ref    : (B_pad, H_PAD)      f32   initial hidden state (read at t==0)
      wcat_ref  : (K_PAD, 3*H_PAD)    bf16  packed [Wr|W|.. ; Ur|..|U] weights
      bcat_ref  : (1, 3*H_PAD)        f32   packed [Ur_b | 0 | U_b] bias
      out_ref   : (B_pad, H_PAD)      f32   final hidden state (written at last t)
      h_scr     : (B_pad, H_PAD)      f32   carried hidden state
      x_scr     : (B_pad, K_PAD)      f32   packed [fact | h] matmul input
    """
    t = pl.program_id(0)

    @pl.when(t == 0)
    def _():
        h_scr[...] = h0_ref[...]

    h_old = h_scr[...]                                   # (B_pad, H_PAD) f32

    # Pack x_cat = [fact_t | h_old] (both halves are 128-lane aligned slices).
    x_scr[:, :rep_pad] = facts_ref[0]
    x_scr[:, rep_pad:] = h_old

    # Single lane-dense MXU matmul, bf16 operands, f32 accumulation.
    #   columns [0 , H)   -> fact@Wr + h@Ur   (reset-gate preactivation)
    #   columns [H , 2H)  -> fact@W
    #   columns [2H, 3H)  -> h@U
    pre = jnp.dot(x_scr[...].astype(jnp.bfloat16), wcat_ref[...],
                  preferred_element_type=jnp.float32) + bcat_ref[...]

    r = jax.nn.sigmoid(pre[:, :h_pad])
    h_t = jnp.tanh(pre[:, h_pad:2 * h_pad] + r * pre[:, 2 * h_pad:])

    g = g_ref[0]                                         # (B_pad, 1) broadcasts
    h_new = h_old + g * (h_t - h_old)                    # == g*h_t + (1-g)*h_old

    h_scr[...] = h_new

    @pl.when(t == pl.num_programs(0) - 1)
    def _():
        out_ref[...] = h_new


def attention_gru_recurrence(facts, h0, gates, params):
    """Run T attention-GRU steps h_t = cell(facts[t], h_{t-1}, gates[t]) in a
    single pallas_call; returns the final hidden state of shape (B, agru_dim).
    """
    T, B, rep_dim = facts.shape
    agru_dim = h0.shape[1]
    wr_t, ur_w_t, ur_b, w_t, u_w_t, u_b = params

    B_pad = _round_up(max(B, 8), 8)
    REP_PAD = _round_up(rep_dim, 128)
    H_PAD = _round_up(agru_dim, 128)
    K_PAD = REP_PAD + H_PAD

    # Packed weight (K_PAD, 3*H_PAD); zero padding keeps padded rows/lanes inert.
    w_cat = jnp.zeros((K_PAD, 3 * H_PAD), jnp.float32)
    w_cat = w_cat.at[:rep_dim, :agru_dim].set(wr_t)
    w_cat = w_cat.at[REP_PAD:REP_PAD + agru_dim, :agru_dim].set(ur_w_t)
    w_cat = w_cat.at[:rep_dim, H_PAD:H_PAD + agru_dim].set(w_t)
    w_cat = w_cat.at[REP_PAD:REP_PAD + agru_dim,
                     2 * H_PAD:2 * H_PAD + agru_dim].set(u_w_t)
    w_cat = w_cat.astype(jnp.bfloat16)        # bf16 weights, VMEM-resident

    b_cat = jnp.zeros((1, 3 * H_PAD), jnp.float32)
    b_cat = b_cat.at[:, :agru_dim].set(ur_b.reshape(1, -1))
    b_cat = b_cat.at[:, 2 * H_PAD:2 * H_PAD + agru_dim].set(u_b.reshape(1, -1))

    # Zero-pad inputs to (8, 128)-aligned shapes once, outside the T loop.
    facts_p = jnp.zeros((T, B_pad, REP_PAD), jnp.float32
                        ).at[:, :B, :rep_dim].set(facts)
    gates_p = jnp.zeros((T, B_pad, 1), jnp.float32).at[:, :B, :].set(gates)
    h0_p = jnp.zeros((B_pad, H_PAD), jnp.float32).at[:B, :agru_dim].set(h0)

    kernel = functools.partial(_agru_fused_kernel, rep_pad=REP_PAD, h_pad=H_PAD)

    out = pl.pallas_call(
        kernel,
        out_shape=jax.ShapeDtypeStruct((B_pad, H_PAD), jnp.float32),
        grid=(T,),
        in_specs=[
            pl.BlockSpec((1, B_pad, REP_PAD), lambda t: (t, 0, 0)),  # facts[t]
            pl.BlockSpec((1, B_pad, 1), lambda t: (t, 0, 0)),        # gates[t]
            pl.BlockSpec((B_pad, H_PAD), lambda t: (0, 0)),          # h0 (resident)
            pl.BlockSpec((K_PAD, 3 * H_PAD), lambda t: (0, 0)),      # W_cat (resident)
            pl.BlockSpec((1, 3 * H_PAD), lambda t: (0, 0)),          # bias  (resident)
        ],
        out_specs=pl.BlockSpec((B_pad, H_PAD), lambda t: (0, 0)),
        scratch_shapes=[
            pltpu.VMEM((B_pad, H_PAD), jnp.float32),   # carried hidden state
            pltpu.VMEM((B_pad, K_PAD), jnp.float32),   # packed [fact | h]
        ],
        compiler_params=pltpu.CompilerParams(
            dimension_semantics=("arbitrary",)),       # sequential recurrence
    )(facts_p, gates_p, h0_p, w_cat, b_cat)

    return out[:B, :agru_dim]


def attention_gru_cell(fact, h_old, g_fact, params):
    """Single AttentionGRUCell.forward step (matches the PyTorch module):
    fused kernel with T = 1."""
    return attention_gru_recurrence(fact[None], h_old, g_fact[None], params)


def reference_step(fact, h_old, g, params, mm_dtype=jnp.float32):
    """Pure-JAX reference of AttentionGRUCell.forward.  mm_dtype lets us mimic
    the kernel's bf16 MXU operands (accumulation stays f32)."""
    wr_t, ur_w_t, ur_b, w_t, u_w_t, u_b = params
    dot = lambda a, b: jnp.dot(a.astype(mm_dtype), b.astype(mm_dtype),
                               preferred_element_type=jnp.float32)
    r = jax.nn.sigmoid(dot(fact, wr_t) + dot(h_old, ur_w_t) + ur_b)
    h_t = jnp.tanh(dot(fact, w_t) + r * (dot(h_old, u_w_t) + u_b))
    return g * h_t + (1.0 - g) * h_old


if __name__ == "__main__":
    B, rep_dim, agru_dim, T = 2, 16, 32, 8

    key = jax.random.PRNGKey(0)
    k = jax.random.split(key, 9)

    # Linear weights stored pre-transposed as (in, out): x @ W_t == Linear(x).
    wr_t = jax.random.normal(k[0], (rep_dim, agru_dim), jnp.float32) * 0.1
    ur_w_t = jax.random.normal(k[1], (agru_dim, agru_dim), jnp.float32) * 0.1
    ur_b = jax.random.normal(k[2], (1, agru_dim), jnp.float32) * 0.1
    w_t = jax.random.normal(k[3], (rep_dim, agru_dim), jnp.float32) * 0.1
    u_w_t = jax.random.normal(k[4], (agru_dim, agru_dim), jnp.float32) * 0.1
    u_b = jax.random.normal(k[5], (1, agru_dim), jnp.float32) * 0.1
    params = (wr_t, ur_w_t, ur_b, w_t, u_w_t, u_b)

    facts = jax.random.normal(k[6], (T, B, rep_dim), jnp.float32)
    h0 = jax.random.normal(k[7], (B, agru_dim), jnp.float32)
    gates = jax.nn.sigmoid(jax.random.normal(k[8], (T, B, 1), jnp.float32))

    # ---- fused T-step recurrence (one pallas_call) -------------------------
    h_fused = jax.block_until_ready(
        attention_gru_recurrence(facts, h0, gates, params))

    # Pure-JAX references: exact f32, and bf16-MXU-operand mimic.
    h_ref32 = h0
    h_refbf = h0
    for t in range(T):
        h_ref32 = reference_step(facts[t], h_ref32, gates[t], params, jnp.float32)
        h_refbf = reference_step(facts[t], h_refbf, gates[t], params, jnp.bfloat16)

    assert h_fused.shape == (B, agru_dim)
    assert jnp.allclose(h_fused, h_refbf, atol=1e-3, rtol=1e-3), \
        "fused recurrence mismatch vs bf16-operand reference"
    assert jnp.allclose(h_fused, h_ref32, atol=5e-2, rtol=5e-2), \
        "fused recurrence mismatch vs f32 reference"

    # ---- single-step (module forward) semantics ----------------------------
    out1 = jax.block_until_ready(
        attention_gru_cell(facts[0], h0, gates[0], params))
    ref1 = reference_step(facts[0], h0, gates[0], params, jnp.float32)
    assert out1.shape == (B, agru_dim)
    assert jnp.allclose(out1, ref1, atol=2e-2, rtol=2e-2), \
        "single-step mismatch vs PyTorch-equivalent reference"

    print("KERNEL_OK")
</pallas_src>

<mosaic_0001>
module attributes {stable_mosaic.version = 11 : i64} {
  func.func @_agru_fused_kernel(%arg0: i32, %arg1: memref<1x8x128xf32, #tpu.memory_space<vmem>>, %arg2: memref<1x8x1xf32, #tpu.memory_space<vmem>>, %arg3: memref<8x128xf32, #tpu.memory_space<vmem>>, %arg4: memref<256x384xbf16, #tpu.memory_space<vmem>>, %arg5: memref<1x384xf32, #tpu.memory_space<vmem>>, %arg6: memref<8x128xf32, #tpu.memory_space<vmem>>, %arg7: memref<8x128xf32, #tpu.memory_space<vmem>>, %arg8: memref<8x256xf32, #tpu.memory_space<vmem>>) attributes {dimension_semantics = [#tpu.dimension_semantics<arbitrary>], iteration_bounds = array<i64: 8>, scalar_prefetch = 0 : i64, scratch_operands = 2 : i64, tpu.core_type = #tpu.core_type<tc>, window_params = [{transform_indices = @transform_0, window_bounds = array<i64: 1, 8, 128>}, {transform_indices = @transform_1, window_bounds = array<i64: 1, 8, 1>}, {pipeline_mode = #tpu.pipeline_mode<synchronous>, transform_indices = @transform_2, window_bounds = array<i64: 8, 128>}, {pipeline_mode = #tpu.pipeline_mode<synchronous>, transform_indices = @transform_3, window_bounds = array<i64: 256, 384>}, {pipeline_mode = #tpu.pipeline_mode<synchronous>, transform_indices = @transform_4, window_bounds = array<i64: 1, 384>}, {pipeline_mode = #tpu.pipeline_mode<synchronous>, transform_indices = @transform_5, window_bounds = array<i64: 8, 128>}]} {
    %c0_i32 = arith.constant 0 : i32
    %0 = arith.cmpi eq, %arg0, %c0_i32 : i32
    %1 = arith.extui %0 : i1 to i32
    %c0_i32_0 = arith.constant 0 : i32
    %2 = arith.cmpi ne, %1, %c0_i32_0 : i32
    scf.if %2 {
      %c0_21 = arith.constant 0 : index
      %c0_22 = arith.constant 0 : index
      %36 = vector.load %arg3[%c0_21, %c0_22] : memref<8x128xf32, #tpu.memory_space<vmem>>, vector<8x128xf32>
      %c0_23 = arith.constant 0 : index
      %c0_24 = arith.constant 0 : index
      %37 = vector.load %arg7[%c0_23, %c0_24] : memref<8x128xf32, #tpu.memory_space<vmem>>, vector<8x128xf32>
      tpu.vector_store %arg7[%c0_23, %c0_24], %36 {strides = array<i32>} : memref<8x128xf32, #tpu.memory_space<vmem>>, vector<8x128xf32>,
    } else {
    }
    %c0 = arith.constant 0 : index
    %c0_1 = arith.constant 0 : index
    %3 = vector.load %arg7[%c0, %c0_1] : memref<8x128xf32, #tpu.memory_space<vmem>>, vector<8x128xf32>
    %c0_2 = arith.constant 0 : index
    %c0_3 = arith.constant 0 : index
    %c0_4 = arith.constant 0 : index
    %4 = vector.load %arg1[%c0_2, %c0_3, %c0_4] : memref<1x8x128xf32, #tpu.memory_space<vmem>>, vector<1x8x128xf32>
    %5 = vector.shape_cast %4 : vector<1x8x128xf32> to vector<8x128xf32>
    %c0_5 = arith.constant 0 : index
    %c0_6 = arith.constant 0 : index
    %6 = vector.load %arg8[%c0_5, %c0_6] : memref<8x256xf32, #tpu.memory_space<vmem>>, vector<8x128xf32>
    tpu.vector_store %arg8[%c0_5, %c0_6], %5 {strides = array<i32>} : memref<8x256xf32, #tpu.memory_space<vmem>>, vector<8x128xf32>,
    %c0_7 = arith.constant 0 : index
    %c128 = arith.constant 128 : index
    %7 = vector.load %arg8[%c0_7, %c128] : memref<8x256xf32, #tpu.memory_space<vmem>>, vector<8x128xf32>
    tpu.vector_store %arg8[%c0_7, %c128], %3 {strides = array<i32>} : memref<8x256xf32, #tpu.memory_space<vmem>>, vector<8x128xf32>,
    %c0_8 = arith.constant 0 : index
    %c0_9 = arith.constant 0 : index
    %8 = vector.load %arg8[%c0_8, %c0_9] : memref<8x256xf32, #tpu.memory_space<vmem>>, vector<8x256xf32>
    %9 = arith.truncf %8 : vector<8x256xf32> to vector<8x256xbf16>
    %c0_10 = arith.constant 0 : index
    %c0_11 = arith.constant 0 : index
    %10 = vector.load %arg4[%c0_10, %c0_11] : memref<256x384xbf16, #tpu.memory_space<vmem>>, vector<256x384xbf16>
    %cst = arith.constant dense<0.000000e+00> : vector<8x384xf32>
    %11 = tpu.matmul %9, %10, %cst {dimension_numbers = #tpu.dot_dimension_numbers<[1], [0], [0], [1], [0, 0, 1, 1], [], []>} : vector<8x256xbf16>, vector<256x384xbf16>, vector<8x384xf32> -> vector<8x384xf32>
    %c0_12 = arith.constant 0 : index
    %c0_13 = arith.constant 0 : index
    %12 = vector.load %arg5[%c0_12, %c0_13] : memref<1x384xf32, #tpu.memory_space<vmem>>, vector<1x384xf32>
    %13 = vector.broadcast %12 : vector<1x384xf32> to vector<8x384xf32>
    %14 = arith.addf %11, %13 : vector<8x384xf32>
    %15 = vector.extract_strided_slice %14 {offsets = [0, 0], sizes = [8, 128], strides = [1, 1]} : vector<8x384xf32> to vector<8x128xf32>
    %16 = arith.negf %15 : vector<8x128xf32>
    %17 = math.exp %16 : vector<8x128xf32>
    %cst_14 = arith.constant 1.000000e+00 : f32
    %18 = vector.broadcast %cst_14 : f32 to vector<8x128xf32>
    %19 = arith.addf %18, %17 : vector<8x128xf32>
    %20 = arith.divf %18, %19 : vector<8x128xf32>
    %21 = vector.extract_strided_slice %14 {offsets = [0, 128], sizes = [8, 128], strides = [1, 1]} : vector<8x384xf32> to vector<8x128xf32>
    %22 = vector.extract_strided_slice %14 {offsets = [0, 256], sizes = [8, 128], strides = [1, 1]} : vector<8x384xf32> to vector<8x128xf32>
    %23 = arith.mulf %20, %22 : vector<8x128xf32>
    %24 = arith.addf %21, %23 : vector<8x128xf32>
    %25 = math.tanh %24 : vector<8x128xf32>
    %c0_15 = arith.constant 0 : index
    %c0_16 = arith.constant 0 : index
    %c0_17 = arith.constant 0 : index
    %26 = vector.load %arg2[%c0_15, %c0_16, %c0_17] : memref<1x8x1xf32, #tpu.memory_space<vmem>>, vector<1x8x1xf32>
    %27 = vector.shape_cast %26 : vector<1x8x1xf32> to vector<8x1xf32>
    %28 = arith.subf %25, %3 : vector<8x128xf32>
    %29 = vector.broadcast %27 : vector<8x1xf32> to vector<8x128xf32>
    %30 = arith.mulf %29, %28 : vector<8x128xf32>
    %31 = arith.addf %3, %30 : vector<8x128xf32>
    %c0_18 = arith.constant 0 : index
    %c0_19 = arith.constant 0 : index
    %32 = vector.load %arg7[%c0_18, %c0_19] : memref<8x128xf32, #tpu.memory_space<vmem>>, vector<8x128xf32>
    tpu.vector_store %arg7[%c0_18, %c0_19], %31 {strides = array<i32>} : memref<8x128xf32, #tpu.memory_space<vmem>>, vector<8x128xf32>,
    %c7_i32 = arith.constant 7 : i32
    %33 = arith.cmpi eq, %arg0, %c7_i32 : i32
    %34 = arith.extui %33 : i1 to i32
    %c0_i32_20 = arith.constant 0 : i32
    %35 = arith.cmpi ne, %34, %c0_i32_20 : i32
    scf.if %35 {
      %c0_21 = arith.constant 0 : index
      %c0_22 = arith.constant 0 : index
      %36 = vector.load %arg6[%c0_21, %c0_22] : memref<8x128xf32, #tpu.memory_space<vmem>>, vector<8x128xf32>
      tpu.vector_store %arg6[%c0_21, %c0_22], %31 {strides = array<i32>} : memref<8x128xf32, #tpu.memory_space<vmem>>, vector<8x128xf32>,
    } else {
    }
    return
  }
  func.func @transform_0(%arg0: i32) -> (i32, i32, i32) {
    %c0_i32 = arith.constant 0 : i32
    %c0_i32_0 = arith.constant 0 : i32
    %c0_i32_1 = arith.constant 0 : i32
    return %arg0, %c0_i32, %c0_i32_0 : i32, i32, i32
  }
  func.func @transform_1(%arg0: i32) -> (i32, i32, i32) {
    %c0_i32 = arith.constant 0 : i32
    %c0_i32_0 = arith.constant 0 : i32
    %c0_i32_1 = arith.constant 0 : i32
    return %arg0, %c0_i32, %c0_i32_0 : i32, i32, i32
  }
  func.func @transform_2(%arg0: i32) -> (i32, i32) {
    %c0_i32 = arith.constant 0 : i32
    %c0_i32_0 = arith.constant 0 : i32
    %c0_i32_1 = arith.constant 0 : i32
    return %c0_i32, %c0_i32_0 : i32, i32
  }
  func.func @transform_3(%arg0: i32) -> (i32, i32) {
    %c0_i32 = arith.constant 0 : i32
    %c0_i32_0 = arith.constant 0 : i32
    %c0_i32_1 = arith.constant 0 : i32
    return %c0_i32, %c0_i32_0 : i32, i32
  }
  func.func @transform_4(%arg0: i32) -> (i32, i32) {
    %c0_i32 = arith.constant 0 : i32
    %c0_i32_0 = arith.constant 0 : i32
    %c0_i32_1 = arith.constant 0 : i32
    return %c0_i32, %c0_i32_0 : i32, i32
  }
  func.func @transform_5(%arg0: i32) -> (i32, i32) {
    %c0_i32 = arith.constant 0 : i32
    %c0_i32_0 = arith.constant 0 : i32
    %c0_i32_1 = arith.constant 0 : i32
    return %c0_i32, %c0_i32_0 : i32, i32
  }
}

</mosaic_0001>

<bundles_post_ra>
// kernel: tpu_custom_call.1
= control target key start
LH: loop header
LB: loop body
LE: loop exit
PB: predicated region body
PF: predicated region fallthrough
CT: control target
= control target key end

     0   :  { %10 = vsyncpa [#allocation5], 0  ;;  %s1232_s0 = inlined_call_operand.vmem [shape: f32[8,8,128], index: 0, kind: input, shape index: {}]   ;;  %s1233_s1 = inlined_call_operand.vmem [shape: f32[8,8,1], index: 1, kind: input, shape index: {}]   ;;  %s1234_s2 = inlined_call_operand.vmem [shape: f32[8,128], index: 2, kind: input, shape index: {}]   ;;  %s1235_s3 = inlined_call_operand.hbm [shape: bf16[256,384], index: 3, kind: input, shape index: {}]   ;;  %s1236_s4 = inlined_call_operand.vmem [shape: f32[1,384], index: 4, kind: input, shape index: {}]   ;;  %s1237_s5 = inlined_call_operand.hbm [shape: f32[8,128], index: 5, kind: output, shape index: {}]  }
   0x1   :  { %11 = vsyncpa [#allocation6], 0  ;;  %s1171_s18 = smov 0  }
   0x2 LB: > { %s172_s21 = sshll.u32 %s1235_s3, 4  ;;  %s1180_s22 = sadd.s32 4294967295, %s1134_s18   ;;  %s1134_s18 = sphi %s1171_s18, %s17_s18   ;;  %s173_s21 = int_to_ptr.hbm [resolvable:$true] %s172_s21 }
   0x3   : > { %p772_p0 = scmp.ge.s32.totalorder %s1134_s18, 1  ;;  %p158_p1 = scmp.lt.s32.totalorder %s1134_s18, 9 }
   0x4   : > { %p773_p2 = scmp.ne.s32.totalorder %s1180_s22, 0  ;;  %p1038_p3 = scmp.eq.s32.totalorder %s1180_s22, 0 }
   0x5   : > { %p159_p4 = pnand %p772_p0, %p158_p1  ;;  %s1136_s23 = smov [#allocation4]  }
   0x6   : > { %s174_s24 = sshll.u32 %s1136_s23, 4  ;;  %s1137_s25 = smov 192   ;;  %s175_s24 = int_to_ptr.vmem [resolvable:$true] %s174_s24 }
   0x7   : > { %p1034_p5 = pneg %p159_p4  ;;  %s1138_s26 = smov 12  }
   0x8   : > { %207 = sbr.rel (%p159_p4) target bundleno = 242 (0xf2), region = 40 }
   0x9   : > { %p1035_p6 = pnand %p1038_p3, %p1034_p5 }
   0xb   : > { %1037 = dma.hbm_to_vmem [thread:$0]  (!%p1035_p6), %s173_s21, 6144, %s175_s24, [#allocation5], %s1137_s25, %s1137_s25, %s1138_s26  }
   0xd   : > { %1125 = dma.done.wait (%p1038_p3), [#allocation5], 6144  }
   0xe   : > { %1127 = vsyncadd (%p1038_p3), [#allocation5], 4294961152  ;;  %p234_p7 = scmp.lt.s32.totalorder %s1180_s22, 7 }
   0xf   : > { %245 = sbr.rel (%p773_p2) target bundleno = 22 (0x16), region = 48 }
  0x10   : > { %s235_s27 = scalar_select %p234_p7, %s1180_s22, 7 }
  0x12   : > { %s777_s28 = sshll.u32 %s235_s27, 3 }
  0x13   : > { %s1191_s6 = scalar_lea.vmem %s1232_s0, %s777_s28  ;;  %s1196_s9 = scalar_lea.vmem %s1233_s1, %s777_s28 }
  0x14   : > { %v246_v0 = vld [vmem:[%s1234_s2] sm:$0xff] }
  0x15   : > { %247 = vst [vmem:[#allocation2] sm:$0xff] %v246_v0 }
  0x16 PF: > { %v866_v1 = vld [vmem:[#allocation4 + $0xa8] sm:$0xf]  ;;  %v1000_v2 = vld [vmem:[#allocation4 + $0xb0] sm:$0xf0]  ;;  %v854_v6 = vld [vmem:[#allocation4 + $0x90] sm:$0xf] }
  0x17   : > { %v962_v3 = vld [vmem:[#allocation4 + $0x168] sm:$0xf]  ;;  %v867_v4 = vor.u32 %v1000_v2, %v866_v1  ;;  %v1024_v5 = vld [vmem:[#allocation4 + $0x170] sm:$0xf0]  ;;  %v997_v7 = vld [vmem:[#allocation4 + $0x98] sm:$0xf0] }
  0x18   : > { %v963_v8 = vor.u32 %v1024_v5, %v962_v3  ;;  %v950_v9 = vld [vmem:[#allocation4 + $0x150] sm:$0xf]  ;;  %v1021_v10 = vld [vmem:[#allocation4 + $0x158] sm:$0xf0]  ;;  %v855_v11 = vor.u32 %v997_v7, %v854_v6  ;;  %v842_v13 = vld [vmem:[#allocation4 + $0x78] sm:$0xf] }
  0x19   : > { %584 = vmatpush.bf16.msra.mxu0 %v867_v4  ;;  %v951_v12 = vor.u32 %v1021_v10, %v950_v9  ;;  %v994_v14 = vld [vmem:[#allocation4 + $0x80] sm:$0xf0]  ;;  %v938_v15 = vld [vmem:[#allocation4 + $0x138] sm:$0xf]  ;;  %v999_v17 = vld [vmem:[#allocation4 + $0xac] sm:$0xf] }
  0x1a   : > { %597 = vmatpush.bf16.msra.mxu1 %v963_v8  ;;  %v1018_v16 = vld [vmem:[#allocation4 + $0x140] sm:$0xf0]  ;;  %v843_v18 = vor.u32 %v994_v14, %v842_v13  ;;  %v868_v19 = vld [vmem:[#allocation4 + $0xb4] sm:$0xf0]  ;;  %v1023_v20 = vld [vmem:[#allocation4 + $0x16c] sm:$0xf] }
  0x1b   : > { %v964_v21 = vld [vmem:[#allocation4 + $0x174] sm:$0xf0]  ;;  %v939_v22 = vor.u32 %v1018_v16, %v938_v15  ;;  %v830_v23 = vld [vmem:[#allocation4 + $0x60] sm:$0xf]  ;;  %v991_v24 = vld [vmem:[#allocation4 + $0x68] sm:$0xf0]  ;;  %v871_v26 = vor.u32 %v999_v17, %v868_v19 }
  0x1c   : > { %v926_v25 = vld [vmem:[#allocation4 + $0x120] sm:$0xf]  ;;  %v967_v27 = vor.u32 %v1023_v20, %v964_v21  ;;  %v1015_v28 = vld [vmem:[#allocation4 + $0x128] sm:$0xf0]  ;;  %v996_v29 = vld [vmem:[#allocation4 + $0x94] sm:$0xf]  ;;  %v831_v34 = vor.u32 %v991_v24, %v830_v23 }
  0x1d   : > { %585 = vmatpush.bf16.msra.mxu0 %v855_v11  ;;  %v856_v30 = vld [vmem:[#allocation4 + $0x9c] sm:$0xf0]  ;;  %610 = vmatpush.bf16.msra.mxu2 %v871_v26  ;;  %v1020_v32 = vld [vmem:[#allocation4 + $0x154] sm:$0xf]  ;;  %v818_v35 = vld [vmem:[#allocation4 + $0x48] sm:$0xf]  ;;  %v927_v38 = vor.u32 %v1015_v28, %v926_v25 }
  0x1e   : > { %598 = vmatpush.bf16.msra.mxu1 %v951_v12  ;;  %623 = vmatpush.bf16.msra.mxu3 %v967_v27  ;;  %v859_v31 = vor.u32 %v996_v29, %v856_v30  ;;  %v952_v33 = vld [vmem:[#allocation4 + $0x15c] sm:$0xf0]  ;;  %v988_v36 = vld [vmem:[#allocation4 + $0x50] sm:$0xf0]  ;;  %v993_v39 = vld [vmem:[#allocation4 + $0x7c] sm:$0xf] }
  0x1f   : > { %v955_v37 = vor.u32 %v1020_v32, %v952_v33  ;;  %v844_v40 = vld [vmem:[#allocation4 + $0x84] sm:$0xf0]  ;;  %v1017_v41 = vld [vmem:[#allocation4 + $0x13c] sm:$0xf]  ;;  %v1012_v43 = vld [vmem:[#allocation4 + $0x110] sm:$0xf0]  ;;  %v819_v47 = vor.u32 %v988_v36, %v818_v35 }
  0x20   : > { %v914_v42 = vld [vmem:[#allocation4 + $0x108] sm:$0xf]  ;;  %v847_v45 = vor.u32 %v993_v39, %v844_v40  ;;  %v990_v48 = vld [vmem:[#allocation4 + $0x64] sm:$0xf]  ;;  %v832_v49 = vld [vmem:[#allocation4 + $0x6c] sm:$0xf0] }
  0x21   : > { %586 = vmatpush.bf16.msra.mxu0 %v843_v18  ;;  %v940_v44 = vld [vmem:[#allocation4 + $0x144] sm:$0xf0]  ;;  %611 = vmatpush.bf16.msra.mxu2 %v859_v31  ;;  %v915_v50 = vor.u32 %v1012_v43, %v914_v42  ;;  %v806_v51 = vld [vmem:[#allocation4 + $0x30] sm:$0xf]  ;;  %v985_v52 = vld [vmem:[#allocation4 + $0x38] sm:$0xf0]  ;;  %v835_v57 = vor.u32 %v990_v48, %v832_v49 }
  0x22   : > { %599 = vmatpush.bf16.msra.mxu1 %v939_v22  ;;  %624 = vmatpush.bf16.msra.mxu3 %v955_v37  ;;  %v943_v46 = vor.u32 %v1017_v41, %v940_v44  ;;  %v902_v53 = vld [vmem:[#allocation4 + $0xf0] sm:$0xf]  ;;  %v1009_v54 = vld [vmem:[#allocation4 + $0xf8] sm:$0xf0]  ;;  %v1014_v55 = vld [vmem:[#allocation4 + $0x124] sm:$0xf]  ;;  %v807_v59 = vor.u32 %v985_v52, %v806_v51 }
  0x23   : > { %v928_v56 = vld [vmem:[#allocation4 + $0x12c] sm:$0xf0]  ;;  %v794_v60 = vld [vmem:[#allocation4 + $0x18] sm:$0xf]  ;;  %v987_v61 = vld [vmem:[#allocation4 + $0x4c] sm:$0xf]  ;;  %v903_v63 = vor.u32 %v1009_v54, %v902_v53 }
  0x24   : > { %v931_v58 = vor.u32 %v1014_v55, %v928_v56  ;;  %v820_v62 = vld [vmem:[#allocation4 + $0x54] sm:$0xf0]  ;;  %v982_v0 = vld [vmem:[#allocation4 + $0x20] sm:$0xf0]  ;;  %v1011_v1 = vld [vmem:[#allocation4 + $0x10c] sm:$0xf] }
  0x25   : > { %587 = vmatpush.bf16.msra.mxu0 %v831_v34  ;;  %612 = vmatpush.bf16.msra.mxu2 %v847_v45  ;;  %v916_v2 = vld [vmem:[#allocation4 + $0x114] sm:$0xf0]  ;;  %v1006_v4 = vld [vmem:[#allocation4 + $0xe0] sm:$0xf0]  ;;  %v823_v5 = vor.u32 %v987_v61, %v820_v62  ;;  %v984_v7 = vld [vmem:[#allocation4 + $0x34] sm:$0xf]  ;;  %v795_v8 = vor.u32 %v982_v0, %v794_v60 }
  0x26   : > { %600 = vmatpush.bf16.msra.mxu1 %v927_v38  ;;  %625 = vmatpush.bf16.msra.mxu3 %v943_v46  ;;  %v890_v3 = vld [vmem:[#allocation4 + $0xd8] sm:$0xf]  ;;  %v919_v6 = vor.u32 %v1011_v1, %v916_v2  ;;  %v808_v9 = vld [vmem:[#allocation4 + $0x3c] sm:$0xf0]  ;;  %v1008_v10 = vld [vmem:[#allocation4 + $0xf4] sm:$0xf] }
  0x27   : > { %v904_v11 = vld [vmem:[#allocation4 + $0xfc] sm:$0xf0]  ;;  %v891_v12 = vor.u32 %v1006_v4, %v890_v3  ;;  %v979_v14 = vld [vmem:[#allocation4 + $0x8] sm:$0xf0]  ;;  %v874_v17 = vld [vmem:[#allocation4 + $0xb0] sm:$0xf]  ;;  %v811_v21 = vor.u32 %v984_v7, %v808_v9 }
  0x28   : > { %v782_v13 = vld [vmem:[#allocation4] sm:$0xf]  ;;  %v1003_v16 = vld [vmem:[#allocation4 + $0xc8] sm:$0xf0]  ;;  %v1001_v18 = vld [vmem:[#allocation4 + $0xb8] sm:$0xf0]  ;;  %v907_v22 = vor.u32 %v1008_v10, %v904_v11 }
  0x29   : > { %588 = vmatpush.bf16.msra.mxu0 %v819_v47  ;;  %613 = vmatpush.bf16.msra.mxu2 %v835_v57  ;;  %v878_v15 = vld [vmem:[#allocation4 + $0xc0] sm:$0xf]  ;;  %v970_v19 = vld [vmem:[#allocation4 + $0x170] sm:$0xf]  ;;  %v1025_v20 = vld [vmem:[#allocation4 + $0x178] sm:$0xf0]  ;;  %v783_v23 = vor.u32 %v979_v14, %v782_v13  ;;  %v875_v28 = vor.u32 %v1001_v18, %v874_v17 }
  0x2a   : > { %601 = vmatpush.bf16.msra.mxu1 %v915_v50  ;;  %626 = vmatpush.bf16.msra.mxu3 %v931_v58  ;;  %v249_v24 = vld [vmem:[%s1191_s6] sm:$0xff]  ;;  %v796_v26 = vld [vmem:[#allocation4 + $0x24] sm:$0xf0]  ;;  %v879_v27 = vor.u32 %v1003_v16, %v878_v15  ;;  %v971_v32 = vor.u32 %v1025_v20, %v970_v19  ;;  %v998_v34 = vld [vmem:[#allocation4 + $0xa0] sm:$0xf0]  ;;  %v1139_v49 = vmov 0  }
  0x2b   : > { %v981_v25 = vld [vmem:[#allocation4 + $0x1c] sm:$0xf]  ;;  %v892_v31 = vld [vmem:[#allocation4 + $0xe4] sm:$0xf0]  ;;  %v862_v33 = vld [vmem:[#allocation4 + $0x98] sm:$0xf]  ;;  %v1206_v35 = vpack.c.bf16 %v249_v24, %v249_v24  ;;  %1055 = vset.pattern.permute.xlu0 %v1139_v49 }
  0x2c   : > { %v1204_v29 = vld [vmem:[#allocation2] sm:$0xff]  ;;  %v1022_v37 = vld [vmem:[#allocation4 + $0x160] sm:$0xf0]  ;;  %v799_v38 = vor.u32 %v981_v25, %v796_v26  ;;  %v784_v42 = vld [vmem:[#allocation4 + $0xc] sm:$0xf0]  ;;  %v863_v43 = vor.u32 %v998_v34, %v862_v33  ;;  %p973_p8 = scmp.ne.s32.totalorder %s1180_s22, 7 }
  0x2d   : > { %589 = vmatpush.bf16.msra.mxu0 %v807_v59  ;;  %614 = vmatpush.bf16.msra.mxu2 %v823_v5  ;;  %v1005_v30 = vld [vmem:[#allocation4 + $0xdc] sm:$0xf]  ;;  %v958_v36 = vld [vmem:[#allocation4 + $0x158] sm:$0xf]  ;;  %v1210_v39 = vpack.c.bf16 %v1204_v29, %v1204_v29  ;;  %v978_v41 = vld [vmem:[#allocation4 + $0x4] sm:$0xf] }
  0x2e   : > { %602 = vmatpush.bf16.msra.mxu1 %v903_v63  ;;  %627 = vmatpush.bf16.msra.mxu3 %v919_v6  ;;  %v895_v40 = vor.u32 %v1005_v30, %v892_v31  ;;  %v1002_v44 = vld [vmem:[#allocation4 + $0xc4] sm:$0xf]  ;;  %v880_v45 = vld [vmem:[#allocation4 + $0xcc] sm:$0xf0]  ;;  %v959_v46 = vor.u32 %v1022_v37, %v958_v36  ;;  %v850_v47 = vld [vmem:[#allocation4 + $0x80] sm:$0xf]  ;;  %v787_v53 = vor.u32 %v978_v41, %v784_v42 }
  0x2f   : > { %v995_v48 = vld [vmem:[#allocation4 + $0x88] sm:$0xf0]  ;;  %v684_v50 = vld [vmem:[%s1196_s9] sm:$0xff]  ;;  %v946_v51 = vld [vmem:[#allocation4 + $0x140] sm:$0xf]  ;;  %v883_v54 = vor.u32 %v1002_v44, %v880_v45 }
  0x30   : > { %v1019_v52 = vld [vmem:[#allocation4 + $0x148] sm:$0xf0]  ;;  %v851_v55 = vor.u32 %v995_v48, %v850_v47  ;;  %688 = vperm.xlu0 %1055, %v684_v50   ;;  %v838_v57 = vld [vmem:[#allocation4 + $0x68] sm:$0xf]  ;;  %v992_v58 = vld [vmem:[#allocation4 + $0x70] sm:$0xf0] }
  0x31   : > { %590 = vmatpush.bf16.msra.mxu0 %v795_v8  ;;  %615 = vmatpush.bf16.msra.mxu2 %v811_v21  ;;  %v947_v56 = vor.u32 %v1019_v52, %v946_v51  ;;  %v934_v59 = vld [vmem:[#allocation4 + $0x128] sm:$0xf]  ;;  %v1016_v60 = vld [vmem:[#allocation4 + $0x130] sm:$0xf0]  ;;  %v839_v61 = vor.u32 %v992_v58, %v838_v57  ;;  %v826_v63 = vld [vmem:[#allocation4 + $0x50] sm:$0xf] }
  0x32   : > { %603 = vmatpush.bf16.msra.mxu1 %v891_v12  ;;  %628 = vmatpush.bf16.msra.mxu3 %v907_v22  ;;  %v935_v62 = vor.u32 %v1016_v60, %v934_v59  ;;  %v989_v0 = vld [vmem:[#allocation4 + $0x58] sm:$0xf0]  ;;  %v922_v1 = vld [vmem:[#allocation4 + $0x110] sm:$0xf]  ;;  %v814_v5 = vld [vmem:[#allocation4 + $0x38] sm:$0xf] }
  0x33   : > { %v1013_v2 = vld [vmem:[#allocation4 + $0x118] sm:$0xf0]  ;;  %v827_v3 = vor.u32 %v989_v0, %v826_v63  ;;  %v986_v6 = vld [vmem:[#allocation4 + $0x40] sm:$0xf0]  ;;  %v910_v7 = vld [vmem:[#allocation4 + $0xf8] sm:$0xf] }
  0x34   : > { %v923_v4 = vor.u32 %v1013_v2, %v922_v1  ;;  %v1010_v8 = vld [vmem:[#allocation4 + $0x100] sm:$0xf0]  ;;  %v815_v9 = vor.u32 %v986_v6, %v814_v5  ;;  %v802_v11 = vld [vmem:[#allocation4 + $0x20] sm:$0xf]  ;;  %v983_v12 = vld [vmem:[#allocation4 + $0x28] sm:$0xf0] }
  0x35   : > { %591 = vmatpush.bf16.msra.mxu0 %v783_v23  ;;  %616 = vmatpush.bf16.msra.mxu2 %v799_v38  ;;  %v911_v10 = vor.u32 %v1010_v8, %v910_v7  ;;  %v898_v13 = vld [vmem:[#allocation4 + $0xe0] sm:$0xf]  ;;  %v1007_v14 = vld [vmem:[#allocation4 + $0xe8] sm:$0xf0]  ;;  %v803_v15 = vor.u32 %v983_v12, %v802_v11  ;;  %v790_v17 = vld [vmem:[#allocation4 + $0x8] sm:$0xf] }
  0x36   : > { %604 = vmatpush.bf16.msra.mxu1 %v879_v27  ;;  %629 = vmatpush.bf16.msra.mxu3 %v895_v40  ;;  %v899_v16 = vor.u32 %v1007_v14, %v898_v13  ;;  %v980_v18 = vld [vmem:[#allocation4 + $0x10] sm:$0xf0]  ;;  %v886_v19 = vld [vmem:[#allocation4 + $0xc8] sm:$0xf]  ;;  %v320_v23 = vld [vmem:[%s1236_s4] sm:$0x7] }
  0x37   : > { %v1004_v20 = vld [vmem:[#allocation4 + $0xd0] sm:$0xf0]  ;;  %v791_v21 = vor.u32 %v980_v18, %v790_v17  ;;  %v322_v24 = vperm.slane %v320_v23, 0  ;;  %v323_v41 = vperm.slane %v320_v23, 1 }
  0x38   : > { %592 = vmatmul.bf16.vlgmr.msra.gmra.mxu0 %v1206_v35  ;;  %v887_v22 = vor.u32 %v1004_v20, %v886_v19 }
  0x39   : > { %636 = vmatpush.bf16.msrb.mxu0 %v875_v28  ;;  %605 = vmatmul.bf16.vlgmr.msra.gmra.mxu1 %v1210_v39 }
  0x3a   : > { %649 = vmatpush.bf16.msrb.mxu1 %v971_v32  ;;  %617 = vmatpush.bf16.msra.mxu2 %v787_v53 }
  0x3b   : > { %630 = vmatpush.bf16.msra.mxu3 %v883_v54 }
  0x3d   : > { %637 = vmatpush.bf16.msrb.mxu0 %v863_v43  ;;  %618 = vmatmul.bf16.vlgmr.msra.gmra.mxu2 %v1206_v35  ;;  %v324_v43 = vperm.slane %v320_v23, 2 }
  0x3e   : > { %650 = vmatpush.bf16.msrb.mxu1 %v959_v46  ;;  %631 = vmatmul.bf16.vlgmr.msra.gmra.mxu3 %v1210_v39 }
  0x41   : > { %638 = vmatpush.bf16.msrb.mxu0 %v851_v55 }
  0x42   : > { %651 = vmatpush.bf16.msrb.mxu1 %v947_v56 }
  0x45   : > { %639 = vmatpush.bf16.msrb.mxu0 %v839_v61 }
  0x46   : > { %652 = vmatpush.bf16.msrb.mxu1 %v935_v62 }
  0x49   : > { %640 = vmatpush.bf16.msrb.mxu0 %v827_v3 }
  0x4a   : > { %653 = vmatpush.bf16.msrb.mxu1 %v923_v4 }
  0x4d   : > { %641 = vmatpush.bf16.msrb.mxu0 %v815_v9 }
  0x4e   : > { %654 = vmatpush.bf16.msrb.mxu1 %v911_v10 }
  0x51   : > { %642 = vmatpush.bf16.msrb.mxu0 %v803_v15 }
  0x52   : > { %655 = vmatpush.bf16.msrb.mxu1 %v899_v16 }
  0x55   : > { %643 = vmatpush.bf16.msrb.mxu0 %v791_v21 }
  0x56   : > { %656 = vmatpush.bf16.msrb.mxu1 %v887_v22 }
  0x58   : > { %644 = vmatmul.bf16.vlgmr.msrb.gmra.mxu0 %v1206_v35 }
  0x59   : > { %657 = vmatmul.bf16.vlgmr.msrb.gmra.mxu1 %v1210_v39 }
  0xa2   : > { %v689_v62 = vpop.permute.xlu0 %688 }
  0xb5   : > { %v593_v25 = vpop.f32.mrf.mxu0 }
  0xb6   : > { %v594_v26 = vadd.f32 %v593_v25, %v322_v24  ;;  %v606_v27 = vpop.f32.mrf.mxu1 }
  0xb8   : > { %v607_v28 = vadd.f32 %v606_v27, %v594_v26 }
  0xba   : > { %v972_v30 = vmul.f32 -1.442695, %v607_v28 }
  0xbc   : > { %1056 = vpow2.f32 %v972_v30 }
  0xbd   : > { %v595_v31 = vpop.f32.mrf.mxu0 }
  0xbe   : > { %v608_v32 = vpop.f32.mrf.mxu1 }
  0xc0   : > { %v619_v34 = vpop.f32.mrf.mxu2 }
  0xc1   : > { %v632_v37 = vpop.f32.mrf.mxu3  ;;  %v620_v47 = vadd.f32 %v619_v34, %v323_v41 }
  0xc2   : > { %v1057_v33 = vpop.eup %1056 }
  0xc3   : > { %v665_v36 = vadd.f32 1.0, %v1057_v33  ;;  %v633_v54 = vadd.f32 %v632_v37, %v620_v47 }
  0xc5   : > { %1058 = vrcp.f32 %v665_v36  ;;  %v677_v44 = vand.u32 2147483648, %v665_v36  ;;  %v675_v46 = vand.u32 2147483647, %v665_v36  ;;  %vm671_vm1 = vweird.f32 %v665_v36 }
  0xc7   : > { %v678_v52 = vor.u32 1.1754944e-38, %v677_v44  ;;  %vm676_vm3 = vcmp.eq.f32.partialorder %v675_v46, 8.507059e+37 }
  0xc8   : > { %v621_v35 = vpop.f32.mrf.mxu2 }
  0xc9   : > { %v634_v39 = vpop.f32.mrf.mxu3 }
  0xcb   : > { %v1059_v38 = vpop.eup %1058 }
  0xcc   : > { %v667_v40 = vmul.f32 %v1059_v38, %v665_v36  ;;  %vm672_vm0 = vweird.f32 %v1059_v38 }
  0xcd   : > { %vm673_vm2 = vmor %vm671_vm1, %vm672_vm0 }
  0xce   : > { %v668_v42 = vsub.f32 1.0, %v667_v40 }
  0xd0   : > { %v669_v45 = vmul.f32 %v1059_v38, %v668_v42 }
  0xd2   : > { %v670_v49 = vadd.f32 %v1059_v38, %v669_v45 }
  0xd4   : > { %v674_v53 = vsel %vm673_vm2, %v1059_v38, %v670_v49 }
  0xd5   : > { %v645_v48 = vpop.f32.mrf.mxu0  ;;  %v679_v56 = vsel %vm676_vm3, %v678_v52, %v674_v53 }
  0xd6   : > { %v646_v50 = vadd.f32 %v645_v48, %v324_v43  ;;  %v658_v51 = vpop.f32.mrf.mxu1 }
  0xd8   : > { %v659_v55 = vadd.f32 %v658_v51, %v646_v50 }
  0xda   : > { %v681_v57 = vmul.f32 %v679_v56, %v659_v55 }
  0xdc   : > { %v682_v58 = vadd.f32 %v681_v57, %v633_v54 }
  0xdd   : > { %v647_v59 = vpop.f32.mrf.mxu0 }
  0xde   : > { %1060 = vtanh.f32 %v682_v58  ;;  %v660_v60 = vpop.f32.mrf.mxu1 }
  0xe4   : > { %v1061_v61 = vpop.eup %1060 }
  0xe5   : > { %v685_v63 = vsub.f32 %v1061_v61, %v1204_v29 }
  0xe7   : > { %v691_v0 = vmul.f32 %v689_v62, %v685_v63  ;;  %697 = sbr.rel (%p973_p8) target bundleno = 237 (0xed), region = 52 }
  0xe9   : > { %v692_v1 = vadd.f32 %v691_v0, %v1204_v29 }
  0xeb   : > { %693 = vst [vmem:[#allocation2] sm:$0xff] %v692_v1 }
  0xec   : > { %698 = vst [vmem:[#allocation7] sm:$0xff] %v692_v1 }
  0xed PF: > { %p1040_p9 = scmp.eq.s32.totalorder %s1180_s22, 7  ;;  %s1140_s14 = smov [#allocation7]  }
  0xee   : > { %s705_s15 = sshll.u32 %s1140_s14, 4  ;;  %s707_s19 = sshll.u32 %s1237_s5, 4  ;;  %s706_s15 = int_to_ptr.vmem [resolvable:$true] %s705_s15  ;;  %s708_s19 = int_to_ptr.hbm [resolvable:$true] %s707_s19 }
  0xef   : > { %1031 = dma.vmem_to_hbm [thread:$0]  (%p1040_p9), %s706_s15, 128, %s708_s19, [#allocation6]  }
  0xf0   : > { %1129 = dma.done.wait (%p1040_p9), [#allocation6], 128  }
  0xf1   : > { %1131 = vsyncadd (%p1040_p9), [#allocation6], 4294967168 }
  0xf2 PF: > { %s17_s18 = sadd.s32 1, %s1134_s18  }
  0xf3   : > { %p14_p10 = scmp.ge.s32.totalorder %s17_s18, 10  }
  0xf5   :  { %16 = sbr.rel (!%p14_p10) target bundleno = 2 (0x2), region = 83 }
  0xfa   :  { %721 = vsyncpa [#allocation5], 1 }
  0xfb   :  { %723 = vsyncpa [#allocation5 + $0x1], 1 }
  0xfc   :  { %724 = vsyncpa [#allocation6], 1 }
  0xfd   :  { %726 = vsyncpa [#allocation6 + $0x1], 1 }

</bundles_post_ra>
